<compile_context>
chip_gen: v7x
topology: tpu7x:2x2x1
jax: 0.10.0
libtpu: 0.0.40
codegen_flags: <defaults>
</compile_context>

<pallas_src>
import jax
import jax.numpy as jnp
from jax.experimental import pallas as pl
from jax.experimental.pallas import tpu as pltpu

EPS = 1e-5
NEG_SLOPE = 0.01


def _image_jacobian_kernel(
    pxin_ref,    # (B, 16)   lanes 0:6 = p, 8:11 = xdot, rest zero
    wfirst_ref,  # (2, 16, 64)  [0] = padded layer-1 weight, [1] = xdot selector
    w2_ref,      # (64, 128)
    w3_ref,      # (128, 64)  columns 60:64 zero
    gb_ref,      # (8, 128)   rows: g1,be1,g2,be2,g3,be3,0,0 (lane-padded)
    wtail_ref,   # (64, 16)   [w4t | blockdiag(W1t,W2t,W3t)], rows 60:64 zero
    out_ref,     # (B, 16)    [J_final | J1 | J2 | J3]
):
    pxin = pxin_ref[...]                                   # (B, 16)
    B = pxin.shape[0]
    inv_b = jnp.float32(1.0 / B)
    ones_row = jnp.ones((1, B), jnp.float32)

    gb = gb_ref[...]                                       # (8, 128)
    g1, be1 = gb[0:1, 0:64], gb[1:2, 0:64]
    g2, be2 = gb[2:3, :], gb[3:4, :]
    g3, be3 = gb[4:5, 0:64], gb[5:6, 0:64]                 # padded lanes are 0

    def bn_leaky(x, gamma, beta):
        # One-pass batch statistics on the MXU (idle otherwise): biased var.
        sx = jnp.dot(ones_row, x, preferred_element_type=jnp.float32)        # (1,F)
        sxx = jnp.dot(ones_row, x * x, preferred_element_type=jnp.float32)   # (1,F)
        mean = sx * inv_b
        var = jnp.maximum(sxx * inv_b - mean * mean, 0.0)
        s = gamma * jax.lax.rsqrt(var + EPS)               # gamma folded into scale
        t = beta - mean * s
        y = x * s + t
        return jnp.where(y > 0, y, NEG_SLOPE * y)          # LeakyReLU(0.01)

    # xdot lane-expansion via selector matmul; independent of the BN chain, so
    # the MXU push overlaps with layer-1/2/3 normalization work.
    xe = jnp.dot(pxin, wfirst_ref[1], preferred_element_type=jnp.float32)    # (B,64)

    # Layer 1: Linear(6->64, bias folded away by BN) + BN + LeakyReLU
    x = jnp.dot(pxin, wfirst_ref[0], preferred_element_type=jnp.float32)     # (B,64)
    x = bn_leaky(x, g1, be1)

    # Layer 2: Linear(64->128) + BN + LeakyReLU
    x = jnp.dot(x, w2_ref[...], preferred_element_type=jnp.float32)          # (B,128)
    x = bn_leaky(x, g2, be2)

    # Layer 3: Linear(128->60, padded to 64) + BN + LeakyReLU
    x = jnp.dot(x, w3_ref[...], preferred_element_type=jnp.float32)          # (B,64)
    x = bn_leaky(x, g3, be3)

    # Scale the three 20-lane blocks by xdot[:,0..2] and run the fused tail:
    #   out16 = [ J_final | J1 | J2 | J3 ]
    scaled = x * xe                                                          # (B,64)
    out_ref[...] = jnp.dot(scaled, wtail_ref[...],
                           preferred_element_type=jnp.float32)


def pack_params(params):
    """Repack raw module parameters into the kernel's fused/padded layout.

    Done once, outside the forward path.  Linear biases b1/b2/b3 are dropped
    because training-mode BatchNorm cancels them exactly.
    """
    (w1, _b1, g1, be1, w2, _b2, g2, be2, w3, _b3, g3, be3, w4t) = params
    f32 = jnp.float32

    # wfirst[0]: layer-1 weight placed in rows 0:6 of a (16,64) slab.
    # wfirst[1]: xdot selector -- rows 8/9/10 carry ones over lane blocks
    #            [0,20) / [20,40) / [40,60); lanes 60:64 stay zero.
    w1p = jnp.zeros((16, 64), f32).at[0:6, :].set(w1.astype(f32))
    sel = (jnp.zeros((16, 64), f32)
           .at[8, 0:20].set(1.0)
           .at[9, 20:40].set(1.0)
           .at[10, 40:60].set(1.0))
    wfirst = jnp.stack([w1p, sel], axis=0)                 # (2, 16, 64)

    # Layer-3 weight padded 60 -> 64 output lanes (zero columns).
    w3p = jnp.pad(w3.astype(f32), ((0, 0), (0, 4)))        # (128, 64)

    # All gamma/beta in one (8,128) slab; padded lanes get gamma=beta=0 so the
    # padded features stay exactly 0 after BN + LeakyReLU.
    gb = jnp.zeros((8, 128), f32)
    gb = gb.at[0, 0:64].set(g1.reshape(-1).astype(f32))
    gb = gb.at[1, 0:64].set(be1.reshape(-1).astype(f32))
    gb = gb.at[2, :].set(g2.reshape(-1).astype(f32))
    gb = gb.at[3, :].set(be2.reshape(-1).astype(f32))
    gb = gb.at[4, 0:60].set(g3.reshape(-1).astype(f32))
    gb = gb.at[5, 0:60].set(be3.reshape(-1).astype(f32))

    # Fused tail: [ w4t | blockdiag(W1t, W2t, W3t) ], padded 60 -> 64 rows.
    z = jnp.zeros((20, 4), f32)
    col_j1 = jnp.concatenate([w4t[0:20], z, z], axis=0)    # (60, 4)
    col_j2 = jnp.concatenate([z, w4t[20:40], z], axis=0)   # (60, 4)
    col_j3 = jnp.concatenate([z, z, w4t[40:60]], axis=0)   # (60, 4)
    w_tail = jnp.concatenate([w4t, col_j1, col_j2, col_j3], axis=1)   # (60, 16)
    w_tail = jnp.pad(w_tail.astype(f32), ((0, 4), (0, 0)))            # (64, 16)

    return (wfirst, w2.astype(f32), w3p, gb, w_tail)


def image_jacobian_forward(p, xdot, packed):
    """p: (B, 6) f32, xdot: (B, 3) f32. Returns (J_final (B,4), jacobian (B,4,3))."""
    B = p.shape[0]
    # One packed (B,16) input instead of two tiny DMAs.
    pxin = (jnp.zeros((B, 16), jnp.float32)
            .at[:, 0:6].set(p.astype(jnp.float32))
            .at[:, 8:11].set(xdot.astype(jnp.float32)))

    vmem = pl.BlockSpec(memory_space=pltpu.MemorySpace.VMEM)
    n_in = 1 + len(packed)

    out16 = pl.pallas_call(
        _image_jacobian_kernel,
        out_shape=jax.ShapeDtypeStruct((B, 16), jnp.float32),
        in_specs=[vmem] * n_in,
        out_specs=vmem,
        # Explicit, v7x-safe VMEM budget (well under half of its 64 MiB).
        compiler_params=pltpu.CompilerParams(vmem_limit_bytes=32 * 1024 * 1024),
    )(pxin, *packed)

    # Glue: unpack the lane-dense slab and build torch.stack([J1,J2,J3], dim=2).
    j_final = out16[:, 0:4]
    jacobian = jnp.stack([out16[:, 4:8], out16[:, 8:12], out16[:, 12:16]], axis=2)
    return j_final, jacobian


def make_params(key):
    """Deterministic synthetic parameters matching the module's raw shapes."""
    ks = jax.random.split(key, 16)
    f32 = jnp.float32

    def lin(kw, fan_in, fan_out):
        # stored as (in, out) == PyTorch weight (out, in) transposed
        return jax.random.normal(kw, (fan_in, fan_out), f32) * (1.0 / jnp.sqrt(fan_in))

    w1 = lin(ks[0], 6, 64)
    b1 = jax.random.normal(ks[1], (1, 64), f32) * 0.1
    g1 = 1.0 + jax.random.normal(ks[2], (1, 64), f32) * 0.1
    be1 = jax.random.normal(ks[3], (1, 64), f32) * 0.1

    w2 = lin(ks[4], 64, 128)
    b2 = jax.random.normal(ks[5], (1, 128), f32) * 0.1
    g2 = 1.0 + jax.random.normal(ks[6], (1, 128), f32) * 0.1
    be2 = jax.random.normal(ks[7], (1, 128), f32) * 0.1

    w3 = lin(ks[8], 128, 60)
    b3 = jax.random.normal(ks[9], (1, 60), f32) * 0.1
    g3 = 1.0 + jax.random.normal(ks[10], (1, 60), f32) * 0.1
    be3 = jax.random.normal(ks[11], (1, 60), f32) * 0.1

    # fc4: Linear(60, 4, bias=False); pass weight.T with shape (60, 4)
    w4t = jax.random.normal(ks[12], (60, 4), f32) * (1.0 / jnp.sqrt(60.0))

    return (w1, b1, g1, be1, w2, b2, g2, be2, w3, b3, g3, be3, w4t)


def _reference_forward(p, xdot, params):
    """Pure-JAX reference of the PyTorch forward (with biases), for checking."""
    (w1, b1, g1, be1, w2, b2, g2, be2, w3, b3, g3, be3, w4t) = params
    x = p
    for w, b, g, be in ((w1, b1, g1, be1), (w2, b2, g2, be2), (w3, b3, g3, be3)):
        x = x @ w + b
        m = jnp.mean(x, axis=0, keepdims=True)
        v = jnp.mean((x - m) ** 2, axis=0, keepdims=True)
        x = (x - m) / jnp.sqrt(v + EPS) * g + be
        x = jnp.where(x > 0, x, NEG_SLOPE * x)
    p1 = x[:, 0:20] * xdot[:, 0:1]
    p2 = x[:, 20:40] * xdot[:, 1:2]
    p3 = x[:, 40:60] * xdot[:, 2:3]
    j1 = p1 @ w4t[0:20]
    j2 = p2 @ w4t[20:40]
    j3 = p3 @ w4t[40:60]
    return j1 + j2 + j3, jnp.stack([j1, j2, j3], axis=2)


if __name__ == "__main__":
    key = jax.random.PRNGKey(0)
    kp, kx, kparams = jax.random.split(key, 3)

    B = 8
    p = jax.random.normal(kp, (B, 6), jnp.float32)
    xdot = jax.random.normal(kx, (B, 3), jnp.float32)
    params = make_params(kparams)
    packed = pack_params(params)

    j_final, jacobian = image_jacobian_forward(p, xdot, packed)
    j_final, jacobian = jax.block_until_ready((j_final, jacobian))

    assert j_final.shape == (B, 4), j_final.shape
    assert jacobian.shape == (B, 4, 3), jacobian.shape

    jf_ref, jac_ref = _reference_forward(p, xdot, params)
    assert jnp.allclose(j_final, jf_ref, atol=1e-4, rtol=1e-4)
    assert jnp.allclose(jacobian, jac_ref, atol=1e-4, rtol=1e-4)

    print("KERNEL_OK")
</pallas_src>

<mosaic_0001>
module attributes {stable_mosaic.version = 11 : i64} {
  func.func @_image_jacobian_kernel(%arg0: memref<8x16xf32, #tpu.memory_space<vmem>>, %arg1: memref<2x16x64xf32, #tpu.memory_space<vmem>>, %arg2: memref<64x128xf32, #tpu.memory_space<vmem>>, %arg3: memref<128x64xf32, #tpu.memory_space<vmem>>, %arg4: memref<8x128xf32, #tpu.memory_space<vmem>>, %arg5: memref<64x16xf32, #tpu.memory_space<vmem>>, %arg6: memref<8x16xf32, #tpu.memory_space<vmem>>) attributes {dimension_semantics = [], scalar_prefetch = 0 : i64, scratch_operands = 0 : i64, tpu.core_type = #tpu.core_type<tc>} {
    %c0 = arith.constant 0 : index
    %c0_0 = arith.constant 0 : index
    %0 = vector.load %arg0[%c0, %c0_0] : memref<8x16xf32, #tpu.memory_space<vmem>>, vector<8x16xf32>
    %cst = arith.constant 1.000000e+00 : f32
    %1 = vector.broadcast %cst : f32 to vector<1x8xf32>
    %c0_1 = arith.constant 0 : index
    %c0_2 = arith.constant 0 : index
    %2 = vector.load %arg4[%c0_1, %c0_2] : memref<8x128xf32, #tpu.memory_space<vmem>>, vector<8x128xf32>
    %3 = vector.extract_strided_slice %2 {offsets = [0, 0], sizes = [1, 64], strides = [1, 1]} : vector<8x128xf32> to vector<1x64xf32>
    %4 = vector.extract_strided_slice %2 {offsets = [1, 0], sizes = [1, 64], strides = [1, 1]} : vector<8x128xf32> to vector<1x64xf32>
    %5 = vector.extract_strided_slice %2 {offsets = [2, 0], sizes = [1, 128], strides = [1, 1]} : vector<8x128xf32> to vector<1x128xf32>
    %6 = vector.extract_strided_slice %2 {offsets = [3, 0], sizes = [1, 128], strides = [1, 1]} : vector<8x128xf32> to vector<1x128xf32>
    %7 = vector.extract_strided_slice %2 {offsets = [4, 0], sizes = [1, 64], strides = [1, 1]} : vector<8x128xf32> to vector<1x64xf32>
    %8 = vector.extract_strided_slice %2 {offsets = [5, 0], sizes = [1, 64], strides = [1, 1]} : vector<8x128xf32> to vector<1x64xf32>
    %c1 = arith.constant 1 : index
    %c0_3 = arith.constant 0 : index
    %c0_4 = arith.constant 0 : index
    %9 = vector.load %arg1[%c1, %c0_3, %c0_4] : memref<2x16x64xf32, #tpu.memory_space<vmem>>, vector<1x16x64xf32>
    %10 = vector.shape_cast %9 : vector<1x16x64xf32> to vector<16x64xf32>
    %cst_5 = arith.constant dense<0.000000e+00> : vector<8x64xf32>
    %11 = tpu.matmul %0, %10, %cst_5 {dimension_numbers = #tpu.dot_dimension_numbers<[1], [0], [0], [1], [0, 0, 1, 1], [], []>} : vector<8x16xf32>, vector<16x64xf32>, vector<8x64xf32> -> vector<8x64xf32>
    %c0_6 = arith.constant 0 : index
    %c0_7 = arith.constant 0 : index
    %c0_8 = arith.constant 0 : index
    %12 = vector.load %arg1[%c0_6, %c0_7, %c0_8] : memref<2x16x64xf32, #tpu.memory_space<vmem>>, vector<1x16x64xf32>
    %13 = vector.shape_cast %12 : vector<1x16x64xf32> to vector<16x64xf32>
    %cst_9 = arith.constant dense<0.000000e+00> : vector<8x64xf32>
    %14 = tpu.matmul %0, %13, %cst_9 {dimension_numbers = #tpu.dot_dimension_numbers<[1], [0], [0], [1], [0, 0, 1, 1], [], []>} : vector<8x16xf32>, vector<16x64xf32>, vector<8x64xf32> -> vector<8x64xf32>
    %cst_10 = arith.constant dense<0.000000e+00> : vector<1x64xf32>
    %15 = tpu.matmul %1, %14, %cst_10 {dimension_numbers = #tpu.dot_dimension_numbers<[1], [0], [0], [1], [0, 0, 1, 1], [], []>} : vector<1x8xf32>, vector<8x64xf32>, vector<1x64xf32> -> vector<1x64xf32>
    %16 = arith.mulf %14, %14 : vector<8x64xf32>
    %cst_11 = arith.constant dense<0.000000e+00> : vector<1x64xf32>
    %17 = tpu.matmul %1, %16, %cst_11 {dimension_numbers = #tpu.dot_dimension_numbers<[1], [0], [0], [1], [0, 0, 1, 1], [], []>} : vector<1x8xf32>, vector<8x64xf32>, vector<1x64xf32> -> vector<1x64xf32>
    %cst_12 = arith.constant 1.250000e-01 : f32
    %18 = vector.broadcast %cst_12 : f32 to vector<1x64xf32>
    %19 = arith.mulf %15, %18 : vector<1x64xf32>
    %cst_13 = arith.constant 1.250000e-01 : f32
    %20 = vector.broadcast %cst_13 : f32 to vector<1x64xf32>
    %21 = arith.mulf %17, %20 : vector<1x64xf32>
    %22 = arith.mulf %19, %19 : vector<1x64xf32>
    %23 = arith.subf %21, %22 : vector<1x64xf32>
    %cst_14 = arith.constant 0.000000e+00 : f32
    %24 = vector.broadcast %cst_14 : f32 to vector<1x64xf32>
    %25 = arith.maximumf %23, %24 : vector<1x64xf32>
    %cst_15 = arith.constant 9.99999974E-6 : f32
    %26 = vector.broadcast %cst_15 : f32 to vector<1x64xf32>
    %27 = arith.addf %25, %26 : vector<1x64xf32>
    %28 = math.rsqrt %27 : vector<1x64xf32>
    %29 = arith.mulf %3, %28 : vector<1x64xf32>
    %30 = arith.mulf %19, %29 : vector<1x64xf32>
    %31 = arith.subf %4, %30 : vector<1x64xf32>
    %32 = vector.broadcast %29 : vector<1x64xf32> to vector<8x64xf32>
    %33 = arith.mulf %14, %32 : vector<8x64xf32>
    %34 = vector.broadcast %31 : vector<1x64xf32> to vector<8x64xf32>
    %35 = arith.addf %33, %34 : vector<8x64xf32>
    %cst_16 = arith.constant 0.000000e+00 : f32
    %36 = vector.broadcast %cst_16 : f32 to vector<8x64xf32>
    %37 = arith.cmpf ogt, %35, %36 : vector<8x64xf32>
    %cst_17 = arith.constant 0.00999999977 : f32
    %38 = vector.broadcast %cst_17 : f32 to vector<8x64xf32>
    %39 = arith.mulf %38, %35 : vector<8x64xf32>
    %40 = arith.select %37, %35, %39 : vector<8x64xi1>, vector<8x64xf32>
    %c0_18 = arith.constant 0 : index
    %c0_19 = arith.constant 0 : index
    %41 = vector.load %arg2[%c0_18, %c0_19] : memref<64x128xf32, #tpu.memory_space<vmem>>, vector<64x128xf32>
    %cst_20 = arith.constant dense<0.000000e+00> : vector<8x128xf32>
    %42 = tpu.matmul %40, %41, %cst_20 {dimension_numbers = #tpu.dot_dimension_numbers<[1], [0], [0], [1], [0, 0, 1, 1], [], []>} : vector<8x64xf32>, vector<64x128xf32>, vector<8x128xf32> -> vector<8x128xf32>
    %cst_21 = arith.constant dense<0.000000e+00> : vector<1x128xf32>
    %43 = tpu.matmul %1, %42, %cst_21 {dimension_numbers = #tpu.dot_dimension_numbers<[1], [0], [0], [1], [0, 0, 1, 1], [], []>} : vector<1x8xf32>, vector<8x128xf32>, vector<1x128xf32> -> vector<1x128xf32>
    %44 = arith.mulf %42, %42 : vector<8x128xf32>
    %cst_22 = arith.constant dense<0.000000e+00> : vector<1x128xf32>
    %45 = tpu.matmul %1, %44, %cst_22 {dimension_numbers = #tpu.dot_dimension_numbers<[1], [0], [0], [1], [0, 0, 1, 1], [], []>} : vector<1x8xf32>, vector<8x128xf32>, vector<1x128xf32> -> vector<1x128xf32>
    %cst_23 = arith.constant 1.250000e-01 : f32
    %46 = vector.broadcast %cst_23 : f32 to vector<1x128xf32>
    %47 = arith.mulf %43, %46 : vector<1x128xf32>
    %cst_24 = arith.constant 1.250000e-01 : f32
    %48 = vector.broadcast %cst_24 : f32 to vector<1x128xf32>
    %49 = arith.mulf %45, %48 : vector<1x128xf32>
    %50 = arith.mulf %47, %47 : vector<1x128xf32>
    %51 = arith.subf %49, %50 : vector<1x128xf32>
    %cst_25 = arith.constant 0.000000e+00 : f32
    %52 = vector.broadcast %cst_25 : f32 to vector<1x128xf32>
    %53 = arith.maximumf %51, %52 : vector<1x128xf32>
    %cst_26 = arith.constant 9.99999974E-6 : f32
    %54 = vector.broadcast %cst_26 : f32 to vector<1x128xf32>
    %55 = arith.addf %53, %54 : vector<1x128xf32>
    %56 = math.rsqrt %55 : vector<1x128xf32>
    %57 = arith.mulf %5, %56 : vector<1x128xf32>
    %58 = arith.mulf %47, %57 : vector<1x128xf32>
    %59 = arith.subf %6, %58 : vector<1x128xf32>
    %60 = vector.broadcast %57 : vector<1x128xf32> to vector<8x128xf32>
    %61 = arith.mulf %42, %60 : vector<8x128xf32>
    %62 = vector.broadcast %59 : vector<1x128xf32> to vector<8x128xf32>
    %63 = arith.addf %61, %62 : vector<8x128xf32>
    %cst_27 = arith.constant 0.000000e+00 : f32
    %64 = vector.broadcast %cst_27 : f32 to vector<8x128xf32>
    %65 = arith.cmpf ogt, %63, %64 : vector<8x128xf32>
    %cst_28 = arith.constant 0.00999999977 : f32
    %66 = vector.broadcast %cst_28 : f32 to vector<8x128xf32>
    %67 = arith.mulf %66, %63 : vector<8x128xf32>
    %68 = arith.select %65, %63, %67 : vector<8x128xi1>, vector<8x128xf32>
    %c0_29 = arith.constant 0 : index
    %c0_30 = arith.constant 0 : index
    %69 = vector.load %arg3[%c0_29, %c0_30] : memref<128x64xf32, #tpu.memory_space<vmem>>, vector<128x64xf32>
    %cst_31 = arith.constant dense<0.000000e+00> : vector<8x64xf32>
    %70 = tpu.matmul %68, %69, %cst_31 {dimension_numbers = #tpu.dot_dimension_numbers<[1], [0], [0], [1], [0, 0, 1, 1], [], []>} : vector<8x128xf32>, vector<128x64xf32>, vector<8x64xf32> -> vector<8x64xf32>
    %cst_32 = arith.constant dense<0.000000e+00> : vector<1x64xf32>
    %71 = tpu.matmul %1, %70, %cst_32 {dimension_numbers = #tpu.dot_dimension_numbers<[1], [0], [0], [1], [0, 0, 1, 1], [], []>} : vector<1x8xf32>, vector<8x64xf32>, vector<1x64xf32> -> vector<1x64xf32>
    %72 = arith.mulf %70, %70 : vector<8x64xf32>
    %cst_33 = arith.constant dense<0.000000e+00> : vector<1x64xf32>
    %73 = tpu.matmul %1, %72, %cst_33 {dimension_numbers = #tpu.dot_dimension_numbers<[1], [0], [0], [1], [0, 0, 1, 1], [], []>} : vector<1x8xf32>, vector<8x64xf32>, vector<1x64xf32> -> vector<1x64xf32>
    %cst_34 = arith.constant 1.250000e-01 : f32
    %74 = vector.broadcast %cst_34 : f32 to vector<1x64xf32>
    %75 = arith.mulf %71, %74 : vector<1x64xf32>
    %cst_35 = arith.constant 1.250000e-01 : f32
    %76 = vector.broadcast %cst_35 : f32 to vector<1x64xf32>
    %77 = arith.mulf %73, %76 : vector<1x64xf32>
    %78 = arith.mulf %75, %75 : vector<1x64xf32>
    %79 = arith.subf %77, %78 : vector<1x64xf32>
    %cst_36 = arith.constant 0.000000e+00 : f32
    %80 = vector.broadcast %cst_36 : f32 to vector<1x64xf32>
    %81 = arith.maximumf %79, %80 : vector<1x64xf32>
    %cst_37 = arith.constant 9.99999974E-6 : f32
    %82 = vector.broadcast %cst_37 : f32 to vector<1x64xf32>
    %83 = arith.addf %81, %82 : vector<1x64xf32>
    %84 = math.rsqrt %83 : vector<1x64xf32>
    %85 = arith.mulf %7, %84 : vector<1x64xf32>
    %86 = arith.mulf %75, %85 : vector<1x64xf32>
    %87 = arith.subf %8, %86 : vector<1x64xf32>
    %88 = vector.broadcast %85 : vector<1x64xf32> to vector<8x64xf32>
    %89 = arith.mulf %70, %88 : vector<8x64xf32>
    %90 = vector.broadcast %87 : vector<1x64xf32> to vector<8x64xf32>
    %91 = arith.addf %89, %90 : vector<8x64xf32>
    %cst_38 = arith.constant 0.000000e+00 : f32
    %92 = vector.broadcast %cst_38 : f32 to vector<8x64xf32>
    %93 = arith.cmpf ogt, %91, %92 : vector<8x64xf32>
    %cst_39 = arith.constant 0.00999999977 : f32
    %94 = vector.broadcast %cst_39 : f32 to vector<8x64xf32>
    %95 = arith.mulf %94, %91 : vector<8x64xf32>
    %96 = arith.select %93, %91, %95 : vector<8x64xi1>, vector<8x64xf32>
    %97 = arith.mulf %96, %11 : vector<8x64xf32>
    %c0_40 = arith.constant 0 : index
    %c0_41 = arith.constant 0 : index
    %98 = vector.load %arg5[%c0_40, %c0_41] : memref<64x16xf32, #tpu.memory_space<vmem>>, vector<64x16xf32>
    %cst_42 = arith.constant dense<0.000000e+00> : vector<8x16xf32>
    %99 = tpu.matmul %97, %98, %cst_42 {dimension_numbers = #tpu.dot_dimension_numbers<[1], [0], [0], [1], [0, 0, 1, 1], [], []>} : vector<8x64xf32>, vector<64x16xf32>, vector<8x16xf32> -> vector<8x16xf32>
    %c0_43 = arith.constant 0 : index
    %c0_44 = arith.constant 0 : index
    %100 = vector.load %arg6[%c0_43, %c0_44] : memref<8x16xf32, #tpu.memory_space<vmem>>, vector<8x16xf32>
    tpu.vector_store %arg6[%c0_43, %c0_44], %99 {strides = array<i32>} : memref<8x16xf32, #tpu.memory_space<vmem>>, vector<8x16xf32>,
    return
  }
}

</mosaic_0001>

<bundles_post_ra>
// kernel: tpu_custom_call.1
= control target key start
LH: loop header
LB: loop body
LE: loop exit
PB: predicated region body
PF: predicated region fallthrough
CT: control target
= control target key end

     0   :  { %v1228_v2 = vmov 0.0|0.0   ;;  %vm1229_vm0 = vmmov 0   ;;  %v1230_v4 = vmov 0.0   ;;  %s1482_s0 = inlined_call_operand.vmem [shape: f32[8,16], index: 0, kind: input, shape index: {}]   ;;  %s1483_s1 = inlined_call_operand.vmem [shape: f32[2,16,64], index: 1, kind: input, shape index: {}]   ;;  %s1484_s2 = inlined_call_operand.vmem [shape: f32[64,128], index: 2, kind: input, shape index: {}]   ;;  %s1485_s3 = inlined_call_operand.vmem [shape: f32[128,64], index: 3, kind: input, shape index: {}]   ;;  %s1486_s4 = inlined_call_operand.vmem [shape: f32[8,128], index: 4, kind: input, shape index: {}]   ;;  %s1487_s5 = inlined_call_operand.vmem [shape: f32[64,16], index: 5, kind: input, shape index: {}]   ;;  %s1488_s6 = inlined_call_operand.hbm [shape: f32[8,16], index: 6, kind: output, shape index: {}]  }
   0x1   :  { %v103_v0 = vld [vmem:[%s1483_s1] sm:$0xff]  ;;  %v104_v1 = vld [vmem:[%s1483_s1 + $0x8] sm:$0xff]  ;;  %1142 = vmatprep.subr.bf16.mxu1 %v1228_v2  ;;  %1033 = vmatprep.mubr.msk.f32.mxu1 %vm1229_vm0, %v1230_v4  ;;  %v957_v5 = vld [vmem:[%s1483_s1 + $0x10] sm:$0xff] }
   0x2   :  { %v1143_v3 = vpack.c.bf16 %v104_v1, %v103_v0  ;;  %v958_v6 = vld [vmem:[%s1483_s1 + $0x18] sm:$0xff] }
   0x3   :  { %11 = vsyncpa [#allocation3], 0  ;;  %1139 = vmatprep.subr.bf16.mxu0 %v1228_v2  ;;  %v1140_v7 = vpack.c.bf16 %v958_v6, %v957_v5  ;;  %1026 = vmatprep.mubr.msk.f32.mxu0 %vm1229_vm0, %v1230_v4  ;;  %v24_v8 = vld [vmem:[%s1482_s0] sm:$0xff]  ;;  %vm29_vm1 = vcmask 130048   ;;  %vm175_vm2 = vcmask 64512   ;;  %v1231_v13 = vmov 1.0  }
   0x4   :  { %1144 = vmatpush3.bf16.msra.mxu1 %v1143_v3  ;;  %v346_v15 = vld [vmem:[%s1484_s2] sm:$0xff]  ;;  %v347_v16 = vld [vmem:[%s1484_s2 + $0x8] sm:$0xff]  ;;  %v348_v18 = vld [vmem:[%s1484_s2 + $0x10] sm:$0xff]  ;;  %v333_v37 = vlaneseq  ;;  %vm354_vm4 = vcmask 523264  }
   0x5   :  { %1141 = vmatpush3.bf16.msra.mxu0 %v1140_v7  ;;  %1041 = vmatprep.subr.mxu1 %v1230_v4  ;;  %v1146_v17 = vpack.c.bf16 %v347_v16, %v346_v15  ;;  %v349_v19 = vld [vmem:[%s1484_s2 + $0x18] sm:$0xff]  ;;  %v350_v21 = vld [vmem:[%s1484_s2 + $0x20] sm:$0xff]  ;;  %v351_v22 = vld [vmem:[%s1484_s2 + $0x28] sm:$0xff] }
   0x6   :  { %1036 = vmatprep.subr.mxu0 %v1230_v4  ;;  %v1149_v20 = vpack.c.bf16 %v349_v19, %v348_v18  ;;  %v1152_v23 = vpack.c.bf16 %v351_v22, %v350_v21  ;;  %v352_v24 = vld [vmem:[%s1484_s2 + $0x30] sm:$0xff]  ;;  %v353_v25 = vld [vmem:[%s1484_s2 + $0x38] sm:$0xff]  ;;  %v1337_v38 = vshrl.u32 %v333_v37, 7  ;;  %v1342_v39 = vld [vmem:[%s1486_s4] sm:$0xff] }
   0x7   :  { %1034 = vmatmul.mubr.msk.f32.vlgmr.msra.gmra.mrb[0].mxu1 %vm29_vm1, %v24_v8  ;;  %v1155_v26 = vpack.c.bf16 %v353_v25, %v352_v24  ;;  %v601_v56 = vld [vmem:[%s1485_s3] sm:$0xff]  ;;  %v602_v57 = vld [vmem:[%s1485_s3 + $0x8] sm:$0xff]  ;;  %v603_v59 = vld [vmem:[%s1485_s3 + $0x10] sm:$0xff] }
   0x8   :  { %1027 = vmatmul.mubr.msk.f32.vlgmr.msra.gmra.mrb[0].mxu0 %vm29_vm1, %v24_v8  ;;  %1043 = vmatprep.mubr.msk.f32.mxu1 %vm1229_vm0, %v1230_v4  ;;  %v335_v40 = vsub.s32 0, %v1337_v38  ;;  %v340_v47 = vsub.s32 1, %v1337_v38  ;;  %v1158_v58 = vpack.c.bf16 %v602_v57, %v601_v56  ;;  %v604_v60 = vld [vmem:[%s1485_s3 + $0x18] sm:$0xff]  ;;  %v605_v62 = vld [vmem:[%s1485_s3 + $0x20] sm:$0xff]  ;;  %v606_v63 = vld [vmem:[%s1485_s3 + $0x28] sm:$0xff] }
   0x9   :  { %1038 = vmatprep.mubr.msk.f32.mxu0 %vm1229_vm0, %v1230_v4  ;;  %v1161_v61 = vpack.c.bf16 %v604_v60, %v603_v59  ;;  %v1164_v0 = vpack.c.bf16 %v606_v63, %v605_v62  ;;  %v607_v1 = vld [vmem:[%s1485_s3 + $0x30] sm:$0xff]  ;;  %v608_v3 = vld [vmem:[%s1485_s3 + $0x38] sm:$0xff]  ;;  %v609_v6 = vld [vmem:[%s1485_s3 + $0x40] sm:$0xff] }
   0xa   :  { %v1167_v5 = vpack.c.bf16 %v608_v3, %v607_v1  ;;  %v610_v7 = vld [vmem:[%s1485_s3 + $0x48] sm:$0xff]  ;;  %v616_v18 = vld [vmem:[%s1485_s3 + $0x78] sm:$0xff]  ;;  %v867_v57 = vld [vmem:[%s1487_s5 + $0x30] sm:$0xff] }
   0xb   :  { %v1170_v8 = vpack.c.bf16 %v610_v7, %v609_v6  ;;  %v614_v15 = vld [vmem:[%s1485_s3 + $0x68] sm:$0xff] }
  0xda   :  { %v171_v9 = vpop.f32.mrb[0].mxu1 }
  0xdb   :  { %v249_v10 = vmul.f32 %v171_v9, %v171_v9  ;;  %v1035_v11 = vpop.f32.mrb[1].mxu1  ;;  %1037 = vmatpush3.msra.mxu0 %v171_v9  ;;  %v1297_v12 = vpop.f32.mrb[0].mxu0 }
  0xdc   :  { %1039 = vmatmul.mubr.msk.f32.vlgmr.msra.gmra.mrb[2].mxu0 %vm175_vm2, %v1231_v13  ;;  %v1028_v14 = vpop.f32.mrb[1].mxu0  ;;  %1145 = vmatprep.subr.bf16.mxu0 %v1228_v2 }
  0xdd   :  { %1042 = vmatpush3.msra.mxu1 %v249_v10  ;;  %1062 = vmatprep.mubr.msk.f32.mxu0 %vm1229_vm0, %v1230_v4  ;;  %v612_v10 = vld [vmem:[%s1485_s3 + $0x58] sm:$0xff]  ;;  %v613_v14 = vld [vmem:[%s1485_s3 + $0x60] sm:$0xff] }
  0xde   :  { %1044 = vmatmul.mubr.msk.f32.vlgmr.msra.gmra.mrb[2].mxu1 %vm175_vm2, %v1231_v13  ;;  %1065 = vmatprep.subr.mxu1 %v1230_v4  ;;  %v1176_v16 = vpack.c.bf16 %v614_v15, %v613_v14 }
  0xdf   :  { %1067 = vmatprep.mubr.msk.f32.mxu1 %vm1229_vm0, %v1230_v4  ;;  %1147 = vmatpush3.bf16.msra.mxu0 %v1146_v17  ;;  %v615_v17 = vld [vmem:[%s1485_s3 + $0x70] sm:$0xff] }
  0xe0   :  { %1148 = vmatprep.subr.bf16.mxu0 %v1228_v2  ;;  %v1179_v19 = vpack.c.bf16 %v616_v18, %v615_v17  ;;  %v854_v18 = vsub.s32 5, %v1337_v38 }
  0xe3   :  { %1150 = vmatpush3.bf16.msra.mxu0 %v1149_v20 }
  0xe4   :  { %1151 = vmatprep.subr.bf16.mxu0 %v1228_v2 }
  0xe7   :  { %1153 = vmatpush3.bf16.msra.mxu0 %v1152_v23 }
  0xe8   :  { %1154 = vmatprep.subr.bf16.mxu0 %v1228_v2 }
  0xeb   :  { %1156 = vmatpush3.bf16.msra.mxu0 %v1155_v26 }
  0xec   :  { %1110 = vmatprep.subr.mxu0 %v1230_v4 }
 0x1af   :  { %v245_v27 = vpop.f32.mrb[2].mxu0 }
 0x1b0   :  { %v320_v28 = vmul.f32 0.125, %v245_v27  ;;  %v1040_v29 = vpop.f32.mrb[3].mxu0 }
 0x1b1   :  { %v316_v30 = vpop.f32.mrb[2].mxu1 }
 0x1b2   :  { %v322_v31 = vmul.f32 %v320_v28, %v320_v28  ;;  %v321_v32 = vmul.f32 0.125, %v316_v30  ;;  %v1045_v33 = vpop.f32.mrb[3].mxu1 }
 0x1b4   :  { %v323_v34 = vsub.f32 %v321_v32, %v322_v31  ;;  %v590_v32 = vsub.s32 2, %v1337_v38 }
 0x1b6   :  { %v324_v35 = vmax.f32 %v323_v34, 0.0 }
 0x1b8   :  { %v325_v36 = vadd.f32 1e-05, %v324_v35 }
 0x1ba   :  { %1198 = vrsqrt.f32 %v325_v36 }
 0x1c4   :  { %v1199_v41 = vpop.eup %1198 }
 0x1c5   :  { %v327_v42 = vmul.f32 %v1199_v41, %v1342_v39  ;;  %v595_v41 = vsub.s32 3, %v1337_v38 }
 0x1c7   :  { %v328_v43 = vmul.f32 %v327_v42, %v320_v28  ;;  %v336_v44 = vrot.slane %v327_v42, %v335_v40 }
 0x1c9   :  { %v330_v45 = vrot.slane %v328_v43, 7  ;;  %v337_v46 = vmul.f32 %v336_v44, %v171_v9  ;;  %v611_v9 = vld [vmem:[%s1485_s3 + $0x50] sm:$0xff] }
 0x1ca   :  { %v1173_v11 = vpack.c.bf16 %v612_v10, %v611_v9  ;;  %v849_v10 = vsub.s32 4, %v1337_v38 }
 0x1cb   :  { %v332_v48 = vsub.f32 %v1342_v39, %v330_v45 }
 0x1cd   :  { %v341_v49 = vrot.slane %v332_v48, %v340_v47 }
 0x1cf   :  { %v342_v50 = vadd.f32 %v341_v49, %v337_v46 }
 0x1d1   :  { %vm343_vm3 = vcmp.gt.f32.partialorder %v342_v50, 0.0  ;;  %v344_v51 = vmul.f32 0.01, %v342_v50 }
 0x1d3   :  { %v345_v52 = vsel %vm343_vm3, %v342_v50, %v344_v51  ;;  %v861_v50 = vld [vmem:[%s1487_s5] sm:$0xff]  ;;  %v862_v51 = vld [vmem:[%s1487_s5 + $0x8] sm:$0xff] }
 0x1d4   :  { %1063 = vmatmul.mubr.msk.f32.vlgmr.msra.gmra.mrb[4].mxu0 %vm354_vm4, %v345_v52  ;;  %v1182_v52 = vpack.c.bf16 %v862_v51, %v861_v50 }
 0x1d5   :  { %1112 = vmatprep.mubr.msk.f32.mxu0 %vm1229_vm0, %v1230_v4 }
 0x2a7   :  { %v1351_v53 = vpop.f32.mrb[4].mxu0 }
 0x2a8   :  { %v498_v54 = vmul.f32 %v1351_v53, %v1351_v53  ;;  %v1064_v55 = vpop.f32.mrb[5].mxu0  ;;  %1066 = vmatpush3.msra.mxu1 %v1351_v53 }
 0x2a9   :  { %1068 = vmatmul.mubr.msk.f32.vlgmr.msra.gmra.mrb[4].mxu1 %vm175_vm2, %v1231_v13  ;;  %1070 = vmatprep.subr.mxu1 %v1230_v4  ;;  %v866_v55 = vld [vmem:[%s1487_s5 + $0x28] sm:$0xff] }
 0x2aa   :  { %1071 = vmatpush3.msra.mxu1 %v498_v54  ;;  %1072 = vmatprep.mubr.msk.f32.mxu1 %vm1229_vm0, %v1230_v4  ;;  %v865_v54 = vld [vmem:[%s1487_s5 + $0x20] sm:$0xff] }
 0x2ab   :  { %1157 = vmatprep.subr.bf16.mxu1 %v1228_v2  ;;  %v1188_v56 = vpack.c.bf16 %v866_v55, %v865_v54 }
 0x2ad   :  { %1073 = vmatmul.mubr.msk.f32.vlgmr.msra.gmra.mrb[6].mxu1 %vm175_vm2, %v1231_v13 }
 0x2ae   :  { %1107 = vmatprep.mubr.msk.f32.mxu1 %vm1229_vm0, %v1230_v4  ;;  %1159 = vmatpush3.bf16.msra.mxu1 %v1158_v58  ;;  %v868_v58 = vld [vmem:[%s1487_s5 + $0x38] sm:$0xff] }
 0x2af   :  { %1160 = vmatprep.subr.bf16.mxu1 %v1228_v2  ;;  %v1191_v59 = vpack.c.bf16 %v868_v58, %v867_v57 }
 0x2b2   :  { %1162 = vmatpush3.bf16.msra.mxu1 %v1161_v61 }
 0x2b3   :  { %1163 = vmatprep.subr.bf16.mxu1 %v1228_v2 }
 0x2b6   :  { %1165 = vmatpush3.bf16.msra.mxu1 %v1164_v0 }
 0x2b7   :  { %1166 = vmatprep.subr.bf16.mxu1 %v1228_v2 }
 0x2ba   :  { %1168 = vmatpush3.bf16.msra.mxu1 %v1167_v5 }
 0x2bb   :  { %1169 = vmatprep.subr.bf16.mxu1 %v1228_v2 }
 0x2be   :  { %1171 = vmatpush3.bf16.msra.mxu1 %v1170_v8 }
 0x2bf   :  { %1172 = vmatprep.subr.bf16.mxu1 %v1228_v2 }
 0x2c2   :  { %1174 = vmatpush3.bf16.msra.mxu1 %v1173_v11 }
 0x2c3   :  { %1175 = vmatprep.subr.bf16.mxu1 %v1228_v2 }
 0x2c6   :  { %1177 = vmatpush3.bf16.msra.mxu1 %v1176_v16 }
 0x2c7   :  { %1178 = vmatprep.subr.bf16.mxu1 %v1228_v2 }
 0x2ca   :  { %1180 = vmatpush3.bf16.msra.mxu1 %v1179_v19 }
 0x37c   :  { %v494_v20 = vpop.f32.mrb[4].mxu1 }
 0x37d   :  { %v569_v21 = vmul.f32 0.125, %v494_v20  ;;  %v1069_v22 = vpop.f32.mrb[5].mxu1 }
 0x37f   :  { %v571_v24 = vmul.f32 %v569_v21, %v569_v21 }
 0x380   :  { %v565_v23 = vpop.f32.mrb[6].mxu1 }
 0x381   :  { %v570_v25 = vmul.f32 0.125, %v565_v23  ;;  %v1074_v26 = vpop.f32.mrb[7].mxu1 }
 0x383   :  { %v572_v27 = vsub.f32 %v570_v25, %v571_v24 }
 0x385   :  { %v573_v28 = vmax.f32 %v572_v27, 0.0 }
 0x387   :  { %v574_v29 = vadd.f32 1e-05, %v573_v28 }
 0x389   :  { %1200 = vrsqrt.f32 %v574_v29 }
 0x393   :  { %v1201_v30 = vpop.eup %1200 }
 0x394   :  { %v577_v31 = vrot.slane %v1201_v30, 6 }
 0x396   :  { %v579_v33 = vmul.f32 %v577_v31, %v1342_v39 }
 0x398   :  { %v581_v34 = vrot.slane %v579_v33, 2  ;;  %v591_v35 = vrot.slane %v579_v33, %v590_v32 }
 0x39a   :  { %v583_v36 = vmul.f32 %v581_v34, %v569_v21  ;;  %v592_v37 = vmul.f32 %v591_v35, %v1351_v53  ;;  %v863_v53 = vld [vmem:[%s1487_s5 + $0x10] sm:$0xff] }
 0x39c   :  { %v585_v40 = vrot.slane %v583_v36, 5 }
 0x39e   :  { %v587_v42 = vsub.f32 %v1342_v39, %v585_v40 }
 0x3a0   :  { %v596_v43 = vrot.slane %v587_v42, %v595_v41 }
 0x3a2   :  { %v597_v44 = vadd.f32 %v596_v43, %v592_v37 }
 0x3a4   :  { %vm598_vm5 = vcmp.gt.f32.partialorder %v597_v44, 0.0  ;;  %v599_v45 = vmul.f32 0.01, %v597_v44 }
 0x3a6   :  { %v600_v46 = vsel %vm598_vm5, %v597_v44, %v599_v45 }
 0x3a7   :  { %1108 = vmatmul.mubr.f32.vlgmr.msra.gmra.mrb[8].mxu1 %v600_v46 }
 0x47a   :  { %v683_v47 = vpop.f32.mrb[8].mxu1 }
 0x47b   :  { %v757_v48 = vmul.f32 %v683_v47, %v683_v47  ;;  %v1109_v49 = vpop.f32.mrb[9].mxu1  ;;  %1111 = vmatpush3.msra.mxu0 %v683_v47 }
 0x47c   :  { %1113 = vmatmul.mubr.msk.f32.vlgmr.msra.gmra.mrb[6].mxu0 %vm175_vm2, %v1231_v13  ;;  %1115 = vmatprep.subr.mxu0 %v1230_v4 }
 0x47d   :  { %1116 = vmatpush3.msra.mxu0 %v757_v48  ;;  %1117 = vmatprep.mubr.msk.f32.mxu0 %vm1229_vm0, %v1230_v4 }
 0x47e   :  { %1181 = vmatprep.subr.bf16.mxu0 %v1228_v2 }
 0x480   :  { %1118 = vmatmul.mubr.msk.f32.vlgmr.msra.gmra.mrb[8].mxu0 %vm175_vm2, %v1231_v13 }
 0x481   :  { %1136 = vmatprep.mubr.msk.f32.mxu0 %vm1229_vm0, %v1230_v4  ;;  %1183 = vmatpush3.bf16.msra.mxu0 %v1182_v52  ;;  %v864_v4 = vld [vmem:[%s1487_s5 + $0x18] sm:$0xff]  ;;  %s1232_s5 = smov [#allocation2]  }
 0x482   :  { %1184 = vmatprep.subr.bf16.mxu0 %v1228_v2  ;;  %v1185_v13 = vpack.c.bf16 %v864_v4, %v863_v53  ;;  %s949_s14 = sshll.u32 %s1232_s5, 4  ;;  %s950_s14 = int_to_ptr.vmem [resolvable:$true] %s949_s14 }
 0x483   :  { %s1204_s15 = scalar_lea.vmem %s950_s14, 128  ;;  %p1209_p1 = scmp.lt.s32.totalorder %s950_s14, %s950_s14 }
 0x484   :  { %p1205_p0 = scmp.ne.s32.totalorder %s950_s14, %s1204_s15  ;;  %p1210_p2 = scmp.lt.s32.totalorder %s1204_s15, %s1204_s15 }
 0x485   :  { %1186 = vmatpush3.bf16.msra.mxu0 %v1185_v13 }
 0x486   :  { %1187 = vmatprep.subr.bf16.mxu0 %v1228_v2  ;;  %p1211_p3 = por %p1210_p2, %p1209_p1 }
 0x488   :  { %p1212_p4 = pnand %p1211_p3, %p1205_p0 }
 0x489   :  { %1189 = vmatpush3.bf16.msra.mxu0 %v1188_v56 }
 0x48a   :  { %1190 = vmatprep.subr.bf16.mxu0 %v1228_v2 }
 0x48d   :  { %1192 = vmatpush3.bf16.msra.mxu0 %v1191_v59 }
 0x54f   :  { %v753_v60 = vpop.f32.mrb[6].mxu0 }
 0x550   :  { %v828_v61 = vmul.f32 0.125, %v753_v60  ;;  %v1114_v62 = vpop.f32.mrb[7].mxu0 }
 0x552   :  { %v830_v0 = vmul.f32 %v828_v61, %v828_v61 }
 0x553   :  { %v824_v63 = vpop.f32.mrb[8].mxu0 }
 0x554   :  { %v829_v1 = vmul.f32 0.125, %v824_v63  ;;  %v1119_v3 = vpop.f32.mrb[9].mxu0 }
 0x556   :  { %v831_v5 = vsub.f32 %v829_v1, %v830_v0 }
 0x558   :  { %v832_v6 = vmax.f32 %v831_v5, 0.0 }
 0x55a   :  { %v833_v7 = vadd.f32 1e-05, %v832_v6 }
 0x55c   :  { %1202 = vrsqrt.f32 %v833_v7 }
 0x566   :  { %v1203_v8 = vpop.eup %1202 }
 0x567   :  { %v836_v9 = vrot.slane %v1203_v8, 4 }
 0x569   :  { %v838_v11 = vmul.f32 %v836_v9, %v1342_v39 }
 0x56b   :  { %v840_v2 = vrot.slane %v838_v11, 4  ;;  %v850_v14 = vrot.slane %v838_v11, %v849_v10 }
 0x56d   :  { %v842_v15 = vmul.f32 %v840_v2, %v828_v61  ;;  %v851_v16 = vmul.f32 %v850_v14, %v683_v47 }
 0x56f   :  { %v844_v17 = vrot.slane %v842_v15, 3 }
 0x571   :  { %v846_v19 = vsub.f32 %v1342_v39, %v844_v17 }
 0x573   :  { %v855_v20 = vrot.slane %v846_v19, %v854_v18 }
 0x575   :  { %v856_v21 = vadd.f32 %v855_v20, %v851_v16 }
 0x577   :  { %vm857_vm6 = vcmp.gt.f32.partialorder %v856_v21, 0.0  ;;  %v858_v22 = vmul.f32 0.01, %v856_v21 }
 0x579   :  { %v859_v23 = vsel %vm857_vm6, %v856_v21, %v858_v22 }
 0x57a   :  { %v860_v24 = vmul.f32 %v859_v23, %v1297_v12 }
 0x57c   :  { %1137 = vmatmul.mubr.msk.f32.vlgmr.msra.gmra.mrb[10].mxu0 %vm354_vm4, %v860_v24 }
 0x64f   :  { %v938_v25 = vpop.f32.mrb[10].mxu0 }
 0x650   :  { %942 = vst.msk [vmem:[#allocation2] sm:$0xff] %vm29_vm1, %v938_v25  ;;  %v1138_v26 = vpop.f32.mrb[11].mxu0 }
 0x651   :  { %1215 = shalt.err (!%p1212_p4)
}
 0x652   :  { %s1216_s18 = scalar_lea.hbm %s1488_s6, 128 }
 0x653   :  { %p1217_p5 = scmp.ne.s32.totalorder %s1488_s6, %s1216_s18  ;;  %p1220_p6 = scmp.lt.u32.totalorder %s1216_s18, %s1488_s6 }
 0x655   :  { %p1222_p7 = pnand %p1220_p6, %p1217_p5 }
 0x657   :  { %1225 = shalt.err (!%p1222_p7)
}
 0x658   :  { %952 = dma.vmem_to_hbm [thread:$0]  %s950_s14, 128, %s1488_s6, [#allocation3]  }
 0x659   :  { %1226 = dma.done.wait [#allocation3], 128  }
 0x65a   :  { %1227 = vsyncadd [#allocation3], 4294967168 }
 0x65b   :  { %956 = vsyncpa [#allocation3], 1 }

</bundles_post_ra>
